<compile_context>
chip_gen: v5e
topology: v5e:2x2
jax: 0.10.0
libtpu: 0.0.40
codegen_flags: <defaults>
</compile_context>

<pallas_src>
import jax
import jax.numpy as jnp
from jax import lax
from jax.experimental import pallas as pl
from jax.experimental.pallas import tpu as pltpu

LANE = 128
SUBLANE = 8

# Below this element count a plain XLA reduction beats kernel-launch overhead.
_PALLAS_MIN_ELEMENTS = 64 * 1024

# Scoped VMEM request: covers 2 inputs x 2 pipeline buffers at the largest
# per-generation tile plus the f32 elementwise temporaries, with headroom,
# while staying well under every generation's physical VMEM (64 MiB on v7x).
_VMEM_LIMIT_BYTES = 32 * 1024 * 1024


def _hw_defaults():
    """Per-TPU-generation tuning: (f32_working_tile_bytes, num_chunks)."""
    kind = ""
    try:
        dev = jax.devices()[0]
        if dev.platform == "tpu":
            kind = str(dev.device_kind).lower()
    except Exception:  # no devices / non-TPU backend: keep conservative defaults
        pass
    if "v7" in kind or "7x" in kind:
        # 2 TensorCores/chip and ~3.2 TB/s HBM: larger tiles keep the ~0.35us
        # per-step overhead small, and 2 chunks feed both cores.
        return 4 * 1024 * 1024, 2
    # v5e / v6e: single TensorCore; 2 MiB f32 tiles already sit near the HBM
    # roofline, and a second chunk would be pure overhead (no parallelism won).
    return 2 * 1024 * 1024, 1


def _make_diff_sums_kernel(total_rows, block_rows, steps_per_chunk, needs_mask):
    """Kernel: per-chunk (8,128) partial sums of |x - y| and (x - y)^2."""
    sub_tiles = block_rows // SUBLANE

    def kernel(x_ref, y_ref, l1_ref, l2_ref, acc1_ref, acc2_ref):
        step = pl.program_id(1)  # reduction axis (last in grid)

        @pl.when(step == 0)
        def _init():
            acc1_ref[...] = jnp.zeros_like(acc1_ref)
            acc2_ref[...] = jnp.zeros_like(acc2_ref)

        # Cast to f32 inside the kernel; HBM traffic stays in the native dtype.
        d = x_ref[...].astype(jnp.float32) - y_ref[...].astype(jnp.float32)

        def accumulate(dv):
            # (block_rows,128) -> (block_rows//8, 8, 128) is layout-preserving
            # (groups of 8 sublanes per vreg); the axis-0 sum is pure VPU vreg
            # adds, so the hot loop has no cross-sublane XLU reduce and each
            # lane's f32 accumulation chain is 8x shorter.
            d3 = dv.reshape(sub_tiles, SUBLANE, LANE)
            acc1_ref[...] += jnp.sum(jnp.abs(d3), axis=0)
            acc2_ref[...] += jnp.sum(d3 * d3, axis=0)

        if needs_mask:
            chunk = pl.program_id(0)
            row0 = (chunk * steps_per_chunk + step) * block_rows
            interior = row0 + block_rows <= total_rows

            @pl.when(interior)
            def _fast():  # interior blocks: no iota / compare / select
                accumulate(d)

            @pl.when(jnp.logical_not(interior))
            def _edge():
                rid = row0 + lax.broadcasted_iota(jnp.int32, d.shape, 0)
                # select (not multiply-by-mask): NaN/Inf-safe neutralization of
                # rows read past the array end and of clamped re-read blocks.
                accumulate(jnp.where(rid < total_rows, d, 0.0))
        else:
            accumulate(d)

        # Only the last reduction step touches the (lane-dense) outputs.
        @pl.when(step == pl.num_programs(1) - 1)
        def _flush():
            l1_ref[0] = acc1_ref[...]
            l2_ref[0] = acc2_ref[...]

    return kernel


def _reduce_diff_sums(x2d, y2d, *, block_rows=None, num_chunks=None,
                      vmem_limit_bytes=_VMEM_LIMIT_BYTES):
    """Returns (sum|x-y|, sum (x-y)^2) over the (rows,128) slabs as f32 scalars."""
    rows = x2d.shape[0]
    itemsize = jnp.dtype(x2d.dtype).itemsize

    f32_tile_bytes, hw_chunks = _hw_defaults()
    if num_chunks is None:
        num_chunks = hw_chunks
    if block_rows is None:
        # Bytes-based tile: size the f32 working set (compute is always f32),
        # so bf16 inputs get 2x the rows of f32 for the same byte budget.
        block_rows = f32_tile_bytes // (LANE * 4)

    # Keep a multiple of 8 sublanes and never exceed the (rounded-up) slab.
    rows_up = SUBLANE * pl.cdiv(rows, SUBLANE)
    block_rows = max(SUBLANE, min((block_rows // SUBLANE) * SUBLANE, rows_up))

    steps = pl.cdiv(rows, block_rows)
    num_chunks = max(1, min(num_chunks, steps))
    steps_per_chunk = pl.cdiv(steps, num_chunks)

    covered_rows = num_chunks * steps_per_chunk * block_rows
    needs_mask = covered_rows != rows                   # ragged / re-read blocks
    needs_clamp = num_chunks * steps_per_chunk > steps  # over-provisioned chunks

    kernel = _make_diff_sums_kernel(rows, block_rows, steps_per_chunk, needs_mask)

    if needs_clamp:
        # Clamp so no fully out-of-bounds block is requested; the in-kernel row
        # mask zeroes the re-read data, so clamping stays exact.  (Keep the
        # clamp and the mask coupled.)
        def in_map(c, i):
            return (jnp.minimum(c * steps_per_chunk + i, steps - 1), 0)
    else:
        def in_map(c, i):
            return (c * steps_per_chunk + i, 0)

    def out_map(c, i):
        return (c, 0, 0)

    n_main = rows * LANE
    cost = pl.CostEstimate(
        flops=5 * n_main,  # sub, abs, add, mul, add per element
        transcendentals=0,
        bytes_accessed=2 * n_main * itemsize + 2 * num_chunks * SUBLANE * LANE * 4,
    )

    l1_parts, l2_parts = pl.pallas_call(
        kernel,
        out_shape=(
            jax.ShapeDtypeStruct((num_chunks, SUBLANE, LANE), jnp.float32),
            jax.ShapeDtypeStruct((num_chunks, SUBLANE, LANE), jnp.float32),
        ),
        grid_spec=pltpu.PrefetchScalarGridSpec(
            num_scalar_prefetch=0,
            grid=(num_chunks, steps_per_chunk),
            in_specs=[
                pl.BlockSpec((block_rows, LANE), in_map),
                pl.BlockSpec((block_rows, LANE), in_map),
            ],
            out_specs=[
                pl.BlockSpec((1, SUBLANE, LANE), out_map),
                pl.BlockSpec((1, SUBLANE, LANE), out_map),
            ],
            scratch_shapes=[
                pltpu.VMEM((SUBLANE, LANE), jnp.float32),
                pltpu.VMEM((SUBLANE, LANE), jnp.float32),
            ],
        ),
        compiler_params=pltpu.CompilerParams(
            dimension_semantics=("parallel", "arbitrary"),
            vmem_limit_bytes=vmem_limit_bytes,
        ),
        cost_estimate=cost,
    )(x2d, y2d)

    # Tiny epilogue: cross-chunk + cross-sublane + cross-lane reduce in XLA.
    return jnp.sum(l1_parts), jnp.sum(l2_parts)


def naive_loss(outputs, inputs, content_embedding, class_embedding=None,
               out_dict=None, epoch=None, *, block_rows=None, num_chunks=None,
               use_pallas=None):
    """JAX/Pallas equivalent of NaiveLoss.forward. Returns {'loss': scalar}."""
    reg_factor = 1e-4
    # Tiny regularization term: plain JAX (a pallas_call here is pure overhead).
    reg = reg_factor * jnp.sum(jnp.square(content_embedding.astype(jnp.float32)))

    n = inputs.size
    assert outputs.size == n, "inputs/outputs must have the same number of elements"

    if use_pallas is None:
        use_pallas = n >= _PALLAS_MIN_ELEMENTS

    if not use_pallas or n < LANE:
        # Small inputs: fixed kernel-launch cost dominates; let XLA fuse it.
        d = inputs.astype(jnp.float32) - outputs.astype(jnp.float32)
        loss = jnp.mean(jnp.abs(d)) + jnp.mean(d * d) + reg
        return {"loss": loss}

    x_flat = inputs.reshape(-1)
    y_flat = outputs.reshape(-1)
    k = (n // LANE) * LANE
    if k != n:
        # Ragged size: the < 128-element remainder is reduced in plain XLA and
        # only the lane-aligned prefix goes to the kernel (no full zero-padded
        # HBM copy of the operands; at worst a contiguous prefix slice).
        dt = x_flat[k:].astype(jnp.float32) - y_flat[k:].astype(jnp.float32)
        tail_l1 = jnp.sum(jnp.abs(dt))
        tail_l2 = jnp.sum(dt * dt)
        x2d = x_flat[:k].reshape(k // LANE, LANE)
        y2d = y_flat[:k].reshape(k // LANE, LANE)
    else:
        tail_l1 = jnp.float32(0.0)
        tail_l2 = jnp.float32(0.0)
        x2d = x_flat.reshape(n // LANE, LANE)   # pure bitcast, no HBM copy
        y2d = y_flat.reshape(n // LANE, LANE)

    l1_sum, l2_sum = _reduce_diff_sums(
        x2d, y2d, block_rows=block_rows, num_chunks=num_chunks)

    loss = (l1_sum + tail_l1 + l2_sum + tail_l2) / jnp.float32(n) + reg
    return {"loss": loss}


if __name__ == "__main__":
    key = jax.random.PRNGKey(0)
    k1, k2, k3, k4, k5, k6, k7, k8 = jax.random.split(key, 8)

    # Small NCHW-shaped inputs/outputs (as the PyTorch module would receive).
    inputs = jax.random.normal(k1, (2, 4, 16, 16), jnp.float32)
    outputs = jax.random.normal(k2, (2, 4, 16, 16), jnp.float32)
    content_embedding = jax.random.normal(k3, (2, 32), jnp.float32)
    class_embedding = jax.random.normal(k4, (2, 32), jnp.float32)  # unused, as in torch

    def reference(outs, ins, emb):
        d = ins.astype(jnp.float32) - outs.astype(jnp.float32)
        return (jnp.mean(jnp.abs(d)) + jnp.mean(d * d)
                + 1e-4 * jnp.sum(emb.astype(jnp.float32) ** 2))

    # 1) Force the Pallas path even at this small size (single-step grid).
    res = naive_loss(outputs, inputs, content_embedding, class_embedding,
                     out_dict={}, use_pallas=True)
    loss = jax.block_until_ready(res["loss"])
    ref = reference(outputs, inputs, content_embedding)
    assert jnp.allclose(loss, ref, rtol=5e-4, atol=1e-5), (loss, ref)

    # 2) Auto dispatch at this size takes the XLA short-circuit path.
    res_small = naive_loss(outputs, inputs, content_embedding, class_embedding,
                           out_dict={})
    loss_small = jax.block_until_ready(res_small["loss"])
    assert jnp.allclose(loss_small, ref, rtol=5e-4, atol=1e-5), (loss_small, ref)

    # 3) Ragged case (105105 elements): XLA tail (<128 elems), non-multiple-of-8
    #    rows, partial-block masking and a clamped re-read block
    #    (num_chunks * steps_per_chunk > steps).
    big_in = jax.random.normal(k5, (3, 5, 77, 91), jnp.float32)
    big_out = jax.random.normal(k6, (3, 5, 77, 91), jnp.float32)
    res_big = naive_loss(big_out, big_in, content_embedding, class_embedding,
                         out_dict={}, use_pallas=True, block_rows=288, num_chunks=2)
    loss_big = jax.block_until_ready(res_big["loss"])
    ref_big = reference(big_out, big_in, content_embedding)
    assert jnp.allclose(loss_big, ref_big, rtol=5e-4, atol=1e-5), (loss_big, ref_big)

    # 4) bf16 inputs, exactly-covering multi-chunk multi-step grid
    #    (no mask, no clamp, in-kernel f32 cast).
    bf_in = jax.random.normal(k7, (4, 8, 64, 64), jnp.float32).astype(jnp.bfloat16)
    bf_out = jax.random.normal(k8, (4, 8, 64, 64), jnp.float32).astype(jnp.bfloat16)
    res_bf = naive_loss(bf_out, bf_in, content_embedding, class_embedding,
                        out_dict={}, use_pallas=True, block_rows=256, num_chunks=2)
    loss_bf = jax.block_until_ready(res_bf["loss"])
    ref_bf = reference(bf_out, bf_in, content_embedding)
    assert jnp.allclose(loss_bf, ref_bf, rtol=5e-3, atol=1e-4), (loss_bf, ref_bf)

    print("KERNEL_OK")
</pallas_src>

<mosaic_0001>
module attributes {stable_mosaic.version = 11 : i64} {
  func.func @kernel(%arg0: i32, %arg1: i32, %arg2: memref<16x128xf32, #tpu.memory_space<vmem>>, %arg3: memref<16x128xf32, #tpu.memory_space<vmem>>, %arg4: memref<1x8x128xf32, #tpu.memory_space<vmem>>, %arg5: memref<1x8x128xf32, #tpu.memory_space<vmem>>, %arg6: memref<8x128xf32, #tpu.memory_space<vmem>>, %arg7: memref<8x128xf32, #tpu.memory_space<vmem>>) attributes {dimension_semantics = [#tpu.dimension_semantics<parallel>, #tpu.dimension_semantics<arbitrary>], iteration_bounds = array<i64: 1, 1>, scalar_prefetch = 0 : i64, scratch_operands = 2 : i64, tpu.core_type = #tpu.core_type<tc>, window_params = [{transform_indices = @transform_0, window_bounds = array<i64: 16, 128>}, {transform_indices = @transform_1, window_bounds = array<i64: 16, 128>}, {transform_indices = @transform_2, window_bounds = array<i64: 1, 8, 128>}, {transform_indices = @transform_3, window_bounds = array<i64: 1, 8, 128>}]} {
    %c0_i32 = arith.constant 0 : i32
    %0 = arith.cmpi eq, %arg1, %c0_i32 : i32
    %1 = arith.extui %0 : i1 to i32
    %c0_i32_0 = arith.constant 0 : i32
    %2 = arith.cmpi ne, %1, %c0_i32_0 : i32
    scf.if %2 {
      %cst_15 = arith.constant 0.000000e+00 : f32
      %20 = vector.broadcast %cst_15 : f32 to vector<8x128xf32>
      %c0_16 = arith.constant 0 : index
      %c0_17 = arith.constant 0 : index
      %21 = vector.load %arg6[%c0_16, %c0_17] : memref<8x128xf32, #tpu.memory_space<vmem>>, vector<8x128xf32>
      tpu.vector_store %arg6[%c0_16, %c0_17], %20 {strides = array<i32>} : memref<8x128xf32, #tpu.memory_space<vmem>>, vector<8x128xf32>,
      %cst_18 = arith.constant 0.000000e+00 : f32
      %22 = vector.broadcast %cst_18 : f32 to vector<8x128xf32>
      %c0_19 = arith.constant 0 : index
      %c0_20 = arith.constant 0 : index
      %23 = vector.load %arg7[%c0_19, %c0_20] : memref<8x128xf32, #tpu.memory_space<vmem>>, vector<8x128xf32>
      tpu.vector_store %arg7[%c0_19, %c0_20], %22 {strides = array<i32>} : memref<8x128xf32, #tpu.memory_space<vmem>>, vector<8x128xf32>,
    } else {
    }
    %c0 = arith.constant 0 : index
    %c0_1 = arith.constant 0 : index
    %3 = vector.load %arg2[%c0, %c0_1] : memref<16x128xf32, #tpu.memory_space<vmem>>, vector<16x128xf32>
    %c0_2 = arith.constant 0 : index
    %c0_3 = arith.constant 0 : index
    %4 = vector.load %arg3[%c0_2, %c0_3] : memref<16x128xf32, #tpu.memory_space<vmem>>, vector<16x128xf32>
    %5 = arith.subf %3, %4 : vector<16x128xf32>
    %6 = vector.shape_cast %5 : vector<16x128xf32> to vector<2x8x128xf32>
    %c0_4 = arith.constant 0 : index
    %c0_5 = arith.constant 0 : index
    %7 = vector.load %arg6[%c0_4, %c0_5] : memref<8x128xf32, #tpu.memory_space<vmem>>, vector<8x128xf32>
    %8 = math.absf %6 : vector<2x8x128xf32>
    %cst = arith.constant dense<0.000000e+00> : vector<8x128xf32>
    %9 = vector.multi_reduction <add>, %8, %cst [0] : vector<2x8x128xf32> to vector<8x128xf32>
    %10 = arith.addf %7, %9 : vector<8x128xf32>
    %c0_6 = arith.constant 0 : index
    %c0_7 = arith.constant 0 : index
    %11 = vector.load %arg6[%c0_6, %c0_7] : memref<8x128xf32, #tpu.memory_space<vmem>>, vector<8x128xf32>
    tpu.vector_store %arg6[%c0_6, %c0_7], %10 {strides = array<i32>} : memref<8x128xf32, #tpu.memory_space<vmem>>, vector<8x128xf32>,
    %c0_8 = arith.constant 0 : index
    %c0_9 = arith.constant 0 : index
    %12 = vector.load %arg7[%c0_8, %c0_9] : memref<8x128xf32, #tpu.memory_space<vmem>>, vector<8x128xf32>
    %13 = arith.mulf %6, %6 : vector<2x8x128xf32>
    %cst_10 = arith.constant dense<0.000000e+00> : vector<8x128xf32>
    %14 = vector.multi_reduction <add>, %13, %cst_10 [0] : vector<2x8x128xf32> to vector<8x128xf32>
    %15 = arith.addf %12, %14 : vector<8x128xf32>
    %c0_11 = arith.constant 0 : index
    %c0_12 = arith.constant 0 : index
    %16 = vector.load %arg7[%c0_11, %c0_12] : memref<8x128xf32, #tpu.memory_space<vmem>>, vector<8x128xf32>
    tpu.vector_store %arg7[%c0_11, %c0_12], %15 {strides = array<i32>} : memref<8x128xf32, #tpu.memory_space<vmem>>, vector<8x128xf32>,
    %c0_i32_13 = arith.constant 0 : i32
    %17 = arith.cmpi eq, %arg1, %c0_i32_13 : i32
    %18 = arith.extui %17 : i1 to i32
    %c0_i32_14 = arith.constant 0 : i32
    %19 = arith.cmpi ne, %18, %c0_i32_14 : i32
    scf.if %19 {
      %c0_15 = arith.constant 0 : index
      %c0_16 = arith.constant 0 : index
      %20 = vector.load %arg6[%c0_15, %c0_16] : memref<8x128xf32, #tpu.memory_space<vmem>>, vector<8x128xf32>
      %c0_17 = arith.constant 0 : index
      %c0_18 = arith.constant 0 : index
      %c0_19 = arith.constant 0 : index
      %21 = vector.load %arg4[%c0_17, %c0_18, %c0_19] : memref<1x8x128xf32, #tpu.memory_space<vmem>>, vector<1x8x128xf32>
      %22 = vector.shape_cast %21 : vector<1x8x128xf32> to vector<8x128xf32>
      %23 = vector.shape_cast %20 : vector<8x128xf32> to vector<1x8x128xf32>
      tpu.vector_store %arg4[%c0_17, %c0_18, %c0_19], %23 {strides = array<i32>} : memref<1x8x128xf32, #tpu.memory_space<vmem>>, vector<1x8x128xf32>,
      %c0_20 = arith.constant 0 : index
      %c0_21 = arith.constant 0 : index
      %24 = vector.load %arg7[%c0_20, %c0_21] : memref<8x128xf32, #tpu.memory_space<vmem>>, vector<8x128xf32>
      %c0_22 = arith.constant 0 : index
      %c0_23 = arith.constant 0 : index
      %c0_24 = arith.constant 0 : index
      %25 = vector.load %arg5[%c0_22, %c0_23, %c0_24] : memref<1x8x128xf32, #tpu.memory_space<vmem>>, vector<1x8x128xf32>
      %26 = vector.shape_cast %25 : vector<1x8x128xf32> to vector<8x128xf32>
      %27 = vector.shape_cast %24 : vector<8x128xf32> to vector<1x8x128xf32>
      tpu.vector_store %arg5[%c0_22, %c0_23, %c0_24], %27 {strides = array<i32>} : memref<1x8x128xf32, #tpu.memory_space<vmem>>, vector<1x8x128xf32>,
    } else {
    }
    return
  }
  func.func @transform_0(%arg0: i32, %arg1: i32) -> (i32, i32) {
    %c1_i32 = arith.constant 1 : i32
    %0 = arith.muli %arg0, %c1_i32 : i32
    %1 = arith.addi %0, %arg1 : i32
    %c0_i32 = arith.constant 0 : i32
    %c0_i32_0 = arith.constant 0 : i32
    return %1, %c0_i32 : i32, i32
  }
  func.func @transform_1(%arg0: i32, %arg1: i32) -> (i32, i32) {
    %c1_i32 = arith.constant 1 : i32
    %0 = arith.muli %arg0, %c1_i32 : i32
    %1 = arith.addi %0, %arg1 : i32
    %c0_i32 = arith.constant 0 : i32
    %c0_i32_0 = arith.constant 0 : i32
    return %1, %c0_i32 : i32, i32
  }
  func.func @transform_2(%arg0: i32, %arg1: i32) -> (i32, i32, i32) {
    %c0_i32 = arith.constant 0 : i32
    %c0_i32_0 = arith.constant 0 : i32
    %c0_i32_1 = arith.constant 0 : i32
    return %arg0, %c0_i32, %c0_i32_0 : i32, i32, i32
  }
  func.func @transform_3(%arg0: i32, %arg1: i32) -> (i32, i32, i32) {
    %c0_i32 = arith.constant 0 : i32
    %c0_i32_0 = arith.constant 0 : i32
    %c0_i32_1 = arith.constant 0 : i32
    return %arg0, %c0_i32, %c0_i32_0 : i32, i32, i32
  }
}

</mosaic_0001>

<bundles_post_ra>
// kernel: tpu_custom_call.1
= control target key start
LH: loop header
LB: loop body
LE: loop exit
PB: predicated region body
PF: predicated region fallthrough
CT: control target
= control target key end

     0   :  { %9 = vsyncpa [#allocation5], 0  ;;  %s272_s0 = inlined_call_operand.hbm [shape: f32[16,128], index: 0, kind: input, shape index: {}]   ;;  %s273_s1 = inlined_call_operand.hbm [shape: f32[16,128], index: 1, kind: input, shape index: {}]   ;;  %s274_s2 = inlined_call_operand.hbm [shape: f32[1,8,128], index: 2, kind: output, shape index: {0}]   ;;  %s275_s3 = inlined_call_operand.hbm [shape: f32[1,8,128], index: 3, kind: output, shape index: {1}]  }
   0x1   :  { %10 = vsyncpa [#allocation8], 0 }
   0x2   :  { %11 = vsyncpa [#allocation6], 0 }
   0x3   :  { %12 = vsyncpa [#allocation11], 0  ;;  %s21_s14 = sshll.u32 %s272_s0, 4  ;;  %s234_s15 = smov [#allocation4]   ;;  %s22_s14 = int_to_ptr.hbm [resolvable:$true] %s21_s14 }
   0x4   :  { %s23_s16 = sshll.u32 %s234_s15, 4  ;;  %s38_s19 = sshll.u32 %s273_s1, 4  ;;  %s24_s16 = int_to_ptr.vmem [resolvable:$true] %s23_s16  ;;  %s39_s19 = int_to_ptr.hbm [resolvable:$true] %s38_s19 }
   0x5   :  { %s235_s20 = smov 128   ;;  %s236_s21 = smov 8  }
   0x6   :  { %29 = dma.hbm_to_vmem [thread:$0]  %s22_s14, 256, %s24_s16, [#allocation5], %s235_s20, %s235_s20, %s236_s21  }
   0x7   :  { %s237_s22 = smov [#allocation7]  }
   0x8   :  { %s40_s23 = sshll.u32 %s237_s22, 4  ;;  %s41_s23 = int_to_ptr.vmem [resolvable:$true] %s40_s23 }
   0x9   :  { %46 = dma.hbm_to_vmem [thread:$0]  %s39_s19, 256, %s41_s23, [#allocation8], %s235_s20, %s235_s20, %s236_s21  }
   0xa   :  { %226 = dma.done.wait [#allocation5], 256  }
   0xb   :  { %227 = vsyncadd [#allocation5], 4294967040 }
   0xc   :  { %228 = dma.done.wait [#allocation8], 256  }
   0xd   :  { %229 = vsyncadd [#allocation8], 4294967040  ;;  %v65_v0 = vld [vmem:[#allocation4] sm:$0xff]  ;;  %v66_v1 = vld [vmem:[#allocation4 + $0x8] sm:$0xff]  ;;  %s238_s0 = smov [#allocation9]   ;;  %s97_s26 = sshll.u32 %s274_s2, 4  ;;  %s98_s26 = int_to_ptr.hbm [resolvable:$true] %s97_s26 }
   0xe   :  { %v67_v2 = vld [vmem:[#allocation7] sm:$0xff]  ;;  %v68_v3 = vld [vmem:[#allocation7 + $0x8] sm:$0xff]  ;;  %s95_s1 = sshll.u32 %s238_s0, 4  ;;  %s239_s27 = smov [#allocation10]   ;;  %s96_s1 = int_to_ptr.vmem [resolvable:$true] %s95_s1 }
   0xf   :  { %v69_v4 = vsub.f32 %v65_v0, %v67_v2  ;;  %v70_v5 = vsub.f32 %v66_v1, %v68_v3  ;;  %s106_s28 = sshll.u32 %s239_s27, 4  ;;  %s108_s4 = sshll.u32 %s275_s3, 4  ;;  %s107_s28 = int_to_ptr.vmem [resolvable:$true] %s106_s28  ;;  %s109_s4 = int_to_ptr.hbm [resolvable:$true] %s108_s4 }
  0x11   :  { %v72_v6 = vand.u32 2147483647, %v69_v4  ;;  %v78_v7 = vmul.f32 %v69_v4, %v69_v4  ;;  %v73_v8 = vand.u32 2147483647, %v70_v5  ;;  %v79_v9 = vmul.f32 %v70_v5, %v70_v5 }
  0x13   :  { %v74_v10 = vadd.f32 %v73_v8, %v72_v6  ;;  %v80_v11 = vadd.f32 %v79_v9, %v78_v7 }
  0x15   :  { %87 = vst [vmem:[#allocation9] sm:$0xff] %v74_v10 }
  0x16   :  { %89 = vst [vmem:[#allocation10] sm:$0xff] %v80_v11  ;;  %100 = dma.vmem_to_hbm [thread:$0]  %s96_s1, 128, %s98_s26, [#allocation6]  }
  0x17   :  { %111 = dma.vmem_to_hbm [thread:$0]  %s107_s28, 128, %s109_s4, [#allocation11]  }
  0x18   :  { %230 = dma.done.wait [#allocation6], 128  }
  0x19   :  { %231 = vsyncadd [#allocation6], 4294967168 }
  0x1a   :  { %232 = dma.done.wait [#allocation11], 128  }
  0x1b   :  { %233 = vsyncadd [#allocation11], 4294967168 }
  0x1c   :  { %120 = vsyncpa [#allocation5], 1 }
  0x1d   :  { %121 = vsyncpa [#allocation8], 1 }
  0x1e   :  { %122 = vsyncpa [#allocation6], 1 }
  0x1f   :  { %123 = vsyncpa [#allocation11], 1 }

</bundles_post_ra>
